<compile_context>
chip_gen: v5e
topology: v5e:2x2
jax: 0.10.0
libtpu: 0.0.40
codegen_flags: <defaults>
</compile_context>

<pallas_src>
import functools

import jax
import jax.numpy as jnp
from jax.experimental import pallas as pl
from jax.experimental.pallas import tpu as pltpu

BN_EPS = 1e-3        # torchvision BasicConv2d BatchNorm eps
DROPOUT_P = 0.5      # nn.Dropout(0.5), module is in default train() mode


# ----------------------------------------------------------------------------
# Kernel 1: stem conv (im2col matmul, BN folded) + ReLU + fused global avgpool
#   grid  : (num_row_tiles,)  -- reduction axis, output block is an accumulator
#   blocks: patches (B, tm, K) bf16 | w (K, Cpad) bf16 | bias (1, Cpad) f32
#   out   : (B, Cpad) f32  (same block every step -> resident accumulator)
# ----------------------------------------------------------------------------
def _conv_pool_kernel(patches_ref, w_ref, bias_ref, out_ref, *, p_valid, tm):
    ri = pl.program_id(0)

    @pl.when(ri == 0)
    def _init():
        out_ref[...] = jnp.zeros_like(out_ref)

    bsz, _, k = patches_ref.shape
    cout = w_ref.shape[1]

    # Single MXU pass over all batches in this row tile (bf16 in, f32 acc).
    x = patches_ref[...].reshape(bsz * tm, k)
    y = jnp.dot(x, w_ref[...], preferred_element_type=jnp.float32)
    y = jnp.maximum(y + bias_ref[...], 0.0)              # folded BN bias + ReLU
    y = y.reshape(bsz, tm, cout)

    # Mask rows past the true number of spatial positions (row-dim padding).
    t_idx = ri * tm + jax.lax.broadcasted_iota(jnp.int32, (bsz, tm, cout), 1)
    y = jnp.where(t_idx < p_valid, y, 0.0)

    # Partial sum of the global average pool.
    out_ref[...] += jnp.sum(y, axis=1)

    @pl.when(ri == pl.num_programs(0) - 1)
    def _finalize():
        out_ref[...] = out_ref[...] * jnp.float32(1.0 / p_valid)


def conv_bn_relu_pool(patches, w_folded, bias_folded, *, p_valid, tm):
    b, p_pad, k = patches.shape
    cout = w_folded.shape[1]
    n_tiles = p_pad // tm
    kernel = functools.partial(_conv_pool_kernel, p_valid=p_valid, tm=tm)
    return pl.pallas_call(
        kernel,
        out_shape=jax.ShapeDtypeStruct((b, cout), jnp.float32),
        grid=(n_tiles,),
        in_specs=[
            pl.BlockSpec((b, tm, k), lambda ri: (0, ri, 0)),   # row tiles stream
            pl.BlockSpec((k, cout), lambda ri: (0, 0)),        # weights resident
            pl.BlockSpec((1, cout), lambda ri: (0, 0)),        # bias resident
        ],
        out_specs=pl.BlockSpec((b, cout), lambda ri: (0, 0)),  # accumulator
        compiler_params=pltpu.CompilerParams(
            dimension_semantics=("arbitrary",)),               # reduction axis
    )(patches, w_folded, bias_folded)


# ----------------------------------------------------------------------------
# Kernel 2: fc head (new Linear) + ReLU + Dropout(0.5) (train mode)
#   Everything is lane-dense (E padded to 128).  Random numbers are supplied
#   from the wrapper; the kernel fuses threshold, scale and mask.
# ----------------------------------------------------------------------------
def _head_kernel(pooled_ref, w_ref, b_ref, rand_ref, out_ref):
    x = pooled_ref[...].astype(jnp.bfloat16)
    logits = jnp.dot(x, w_ref[...],
                     preferred_element_type=jnp.float32) + b_ref[...]   # fc
    act = jnp.maximum(logits, 0.0)                                      # ReLU
    keep = rand_ref[...] >= jnp.float32(DROPOUT_P)                      # P=0.5
    out_ref[...] = jnp.where(keep, act * jnp.float32(1.0 / (1.0 - DROPOUT_P)),
                             0.0)


def encoder_head(pooled, w, b, rand):
    bsz = pooled.shape[0]
    e_pad = w.shape[1]
    return pl.pallas_call(
        _head_kernel,
        out_shape=jax.ShapeDtypeStruct((bsz, e_pad), jnp.float32),
        in_specs=[pl.BlockSpec(memory_space=pltpu.MemorySpace.VMEM)] * 4,
        out_specs=pl.BlockSpec(memory_space=pltpu.MemorySpace.VMEM),
    )(pooled, w, b, rand)


# ----------------------------------------------------------------------------
# Glue: im2col patch extraction (pure JAX), parameter construction, forward
# ----------------------------------------------------------------------------
def im2col(x_nhwc, k, stride):
    b, h, w, c = x_nhwc.shape
    oh = (h - k) // stride + 1
    ow = (w - k) // stride + 1
    patches = []
    for i in range(k):
        for j in range(k):
            patches.append(
                x_nhwc[:, i:i + stride * oh:stride, j:j + stride * ow:stride, :])
    p = jnp.stack(patches, axis=-2)                    # (B, OH, OW, k*k, C)
    return p.reshape(b, oh * ow, k * k * c), oh, ow


def make_params(embedding_size, c_in=3, c_stem=32, k=3, c_pad=128, e_pad=128):
    ks = jax.random.split(jax.random.PRNGKey(42), 4)
    # Stem conv weight flattened to (k*k*Cin, Cout), BN params (eval stats).
    w_conv = 0.1 * jax.random.normal(ks[0], (k * k * c_in, c_stem), jnp.float32)
    gamma = jnp.ones((c_stem,), jnp.float32)
    beta = jnp.zeros((c_stem,), jnp.float32)
    mean = 0.01 * jax.random.normal(ks[1], (c_stem,), jnp.float32)
    var = jnp.ones((c_stem,), jnp.float32)
    # Fold BN into the conv: w' = w*scale, b' = beta - mean*scale (exact in eval).
    scale = gamma * jax.lax.rsqrt(var + BN_EPS)
    w_folded = w_conv * scale[None, :]
    b_folded = beta - mean * scale
    # Zero-pad Cout -> 128 so kernel outputs are lane-dense; padded channels
    # produce exactly 0 after ReLU, so downstream math is unaffected.
    w_folded = jnp.pad(w_folded, ((0, 0), (0, c_pad - c_stem)))
    b_folded = jnp.pad(b_folded, (0, c_pad - c_stem))[None, :]       # (1, Cpad)
    # New fc head: Linear(c_stem -> embedding_size), padded to (Cpad, Epad).
    w_fc = 0.1 * jax.random.normal(ks[2], (c_stem, embedding_size), jnp.float32)
    b_fc = 0.01 * jax.random.normal(ks[3], (embedding_size,), jnp.float32)
    w_fc = jnp.pad(w_fc, ((0, c_pad - c_stem), (0, e_pad - embedding_size)))
    b_fc = jnp.pad(b_fc, (0, e_pad - embedding_size))[None, :]       # (1, Epad)
    return dict(w_conv=w_folded.astype(jnp.bfloat16),
                b_conv=b_folded,
                w_fc=w_fc.astype(jnp.bfloat16),
                b_fc=b_fc,
                emb=embedding_size)


def encoder_forward(images_nchw, params, dropout_seed=0, tm=128):
    # For real Inception-sized inputs tm should be 512-1024; here P=225 so
    # tm=128 already gives a 2-step pipelined grid.
    x = jnp.transpose(images_nchw, (0, 2, 3, 1)).astype(jnp.float32)  # NHWC
    patches, oh, ow = im2col(x, k=3, stride=2)          # (B, P, 27)
    b, p, k = patches.shape
    p_pad = ((p + tm - 1) // tm) * tm
    patches = jnp.pad(patches, ((0, 0), (0, p_pad - p), (0, 0)))
    patches = patches.astype(jnp.bfloat16)              # bf16 MXU operands
    pooled = conv_bn_relu_pool(patches, params["w_conv"], params["b_conv"],
                               p_valid=p, tm=tm)        # (B, Cpad) f32
    e_pad = params["w_fc"].shape[1]
    rand = jax.random.uniform(jax.random.PRNGKey(dropout_seed), (b, e_pad),
                              dtype=jnp.float32)
    out = encoder_head(pooled, params["w_fc"], params["b_fc"], rand)
    return out[:, :params["emb"]]                       # slice off lane padding


if __name__ == "__main__":
    embedding_size = 16
    params = make_params(embedding_size)
    # Small synthetic images: batch=2, 3 channels, 32x32 spatial (NCHW).
    images = jax.random.normal(jax.random.PRNGKey(0), (2, 3, 32, 32),
                               dtype=jnp.float32)
    out = encoder_forward(images, params, dropout_seed=0)
    out = jax.block_until_ready(out)
    assert out.shape == (2, embedding_size)
    assert out.dtype == jnp.float32
    print("KERNEL_OK")
</pallas_src>

<mosaic_0001>
module attributes {stable_mosaic.version = 11 : i64} {
  func.func @_conv_pool_kernel(%arg0: i32, %arg1: memref<2x128x27xbf16, #tpu.memory_space<vmem>>, %arg2: memref<27x128xbf16, #tpu.memory_space<vmem>>, %arg3: memref<1x128xf32, #tpu.memory_space<vmem>>, %arg4: memref<2x128xf32, #tpu.memory_space<vmem>>) attributes {dimension_semantics = [#tpu.dimension_semantics<arbitrary>], iteration_bounds = array<i64: 2>, scalar_prefetch = 0 : i64, scratch_operands = 0 : i64, tpu.core_type = #tpu.core_type<tc>, window_params = [{transform_indices = @transform_0, window_bounds = array<i64: 2, 128, 27>}, {pipeline_mode = #tpu.pipeline_mode<synchronous>, transform_indices = @transform_1, window_bounds = array<i64: 27, 128>}, {pipeline_mode = #tpu.pipeline_mode<synchronous>, transform_indices = @transform_2, window_bounds = array<i64: 1, 128>}, {pipeline_mode = #tpu.pipeline_mode<synchronous>, transform_indices = @transform_3, window_bounds = array<i64: 2, 128>}]} {
    %c0_i32 = arith.constant 0 : i32
    %0 = arith.cmpi eq, %arg0, %c0_i32 : i32
    %1 = arith.extui %0 : i1 to i32
    %c0_i32_0 = arith.constant 0 : i32
    %2 = arith.cmpi ne, %1, %c0_i32_0 : i32
    scf.if %2 {
      %cst_15 = arith.constant 0.000000e+00 : f32
      %28 = vector.broadcast %cst_15 : f32 to vector<2x128xf32>
      %c0_16 = arith.constant 0 : index
      %c0_17 = arith.constant 0 : index
      %29 = vector.load %arg4[%c0_16, %c0_17] : memref<2x128xf32, #tpu.memory_space<vmem>>, vector<2x128xf32>
      tpu.vector_store %arg4[%c0_16, %c0_17], %28 {strides = array<i32>} : memref<2x128xf32, #tpu.memory_space<vmem>>, vector<2x128xf32>,
    } else {
    }
    %c0 = arith.constant 0 : index
    %c0_1 = arith.constant 0 : index
    %c0_2 = arith.constant 0 : index
    %3 = vector.load %arg1[%c0, %c0_1, %c0_2] : memref<2x128x27xbf16, #tpu.memory_space<vmem>>, vector<2x128x27xbf16>
    %4 = vector.shape_cast %3 : vector<2x128x27xbf16> to vector<256x27xbf16>
    %c0_3 = arith.constant 0 : index
    %c0_4 = arith.constant 0 : index
    %5 = vector.load %arg2[%c0_3, %c0_4] : memref<27x128xbf16, #tpu.memory_space<vmem>>, vector<27x128xbf16>
    %cst = arith.constant dense<0.000000e+00> : vector<256x128xf32>
    %6 = tpu.matmul %4, %5, %cst {dimension_numbers = #tpu.dot_dimension_numbers<[1], [0], [0], [1], [0, 0, 1, 1], [], []>} : vector<256x27xbf16>, vector<27x128xbf16>, vector<256x128xf32> -> vector<256x128xf32>
    %c0_5 = arith.constant 0 : index
    %c0_6 = arith.constant 0 : index
    %7 = vector.load %arg3[%c0_5, %c0_6] : memref<1x128xf32, #tpu.memory_space<vmem>>, vector<1x128xf32>
    %8 = vector.broadcast %7 : vector<1x128xf32> to vector<256x128xf32>
    %9 = arith.addf %6, %8 : vector<256x128xf32>
    %cst_7 = arith.constant 0.000000e+00 : f32
    %10 = vector.broadcast %cst_7 : f32 to vector<256x128xf32>
    %11 = arith.maximumf %9, %10 : vector<256x128xf32>
    %12 = vector.shape_cast %11 : vector<256x128xf32> to vector<2x128x128xf32>
    %c128_i32 = arith.constant 128 : i32
    %13 = arith.muli %arg0, %c128_i32 : i32
    %14 = tpu.iota {dimensions = array<i32: 1>} : vector<2x128x128xi32>
    %15 = vector.broadcast %13 : i32 to vector<2x128x128xi32>
    %16 = arith.addi %15, %14 : vector<2x128x128xi32>
    %c225_i32 = arith.constant 225 : i32
    %17 = vector.broadcast %c225_i32 : i32 to vector<2x128x128xi32>
    %18 = arith.cmpi slt, %16, %17 : vector<2x128x128xi32>
    %cst_8 = arith.constant 0.000000e+00 : f32
    %19 = vector.broadcast %cst_8 : f32 to vector<2x128x128xf32>
    %20 = arith.select %18, %12, %19 : vector<2x128x128xi1>, vector<2x128x128xf32>
    %c0_9 = arith.constant 0 : index
    %c0_10 = arith.constant 0 : index
    %21 = vector.load %arg4[%c0_9, %c0_10] : memref<2x128xf32, #tpu.memory_space<vmem>>, vector<2x128xf32>
    %cst_11 = arith.constant dense<0.000000e+00> : vector<2x128xf32>
    %22 = vector.multi_reduction <add>, %20, %cst_11 [1] : vector<2x128x128xf32> to vector<2x128xf32>
    %23 = arith.addf %21, %22 : vector<2x128xf32>
    %c0_12 = arith.constant 0 : index
    %c0_13 = arith.constant 0 : index
    %24 = vector.load %arg4[%c0_12, %c0_13] : memref<2x128xf32, #tpu.memory_space<vmem>>, vector<2x128xf32>
    tpu.vector_store %arg4[%c0_12, %c0_13], %23 {strides = array<i32>} : memref<2x128xf32, #tpu.memory_space<vmem>>, vector<2x128xf32>,
    %c1_i32 = arith.constant 1 : i32
    %25 = arith.cmpi eq, %arg0, %c1_i32 : i32
    %26 = arith.extui %25 : i1 to i32
    %c0_i32_14 = arith.constant 0 : i32
    %27 = arith.cmpi ne, %26, %c0_i32_14 : i32
    scf.if %27 {
      %c0_15 = arith.constant 0 : index
      %c0_16 = arith.constant 0 : index
      %28 = vector.load %arg4[%c0_15, %c0_16] : memref<2x128xf32, #tpu.memory_space<vmem>>, vector<2x128xf32>
      %cst_17 = arith.constant 0.00444444455 : f32
      %29 = vector.broadcast %cst_17 : f32 to vector<2x128xf32>
      %30 = arith.mulf %28, %29 : vector<2x128xf32>
      %c0_18 = arith.constant 0 : index
      %c0_19 = arith.constant 0 : index
      %31 = vector.load %arg4[%c0_18, %c0_19] : memref<2x128xf32, #tpu.memory_space<vmem>>, vector<2x128xf32>
      tpu.vector_store %arg4[%c0_18, %c0_19], %30 {strides = array<i32>} : memref<2x128xf32, #tpu.memory_space<vmem>>, vector<2x128xf32>,
    } else {
    }
    return
  }
  func.func @transform_0(%arg0: i32) -> (i32, i32, i32) {
    %c0_i32 = arith.constant 0 : i32
    %c0_i32_0 = arith.constant 0 : i32
    %c0_i32_1 = arith.constant 0 : i32
    return %c0_i32, %arg0, %c0_i32_0 : i32, i32, i32
  }
  func.func @transform_1(%arg0: i32) -> (i32, i32) {
    %c0_i32 = arith.constant 0 : i32
    %c0_i32_0 = arith.constant 0 : i32
    %c0_i32_1 = arith.constant 0 : i32
    return %c0_i32, %c0_i32_0 : i32, i32
  }
  func.func @transform_2(%arg0: i32) -> (i32, i32) {
    %c0_i32 = arith.constant 0 : i32
    %c0_i32_0 = arith.constant 0 : i32
    %c0_i32_1 = arith.constant 0 : i32
    return %c0_i32, %c0_i32_0 : i32, i32
  }
  func.func @transform_3(%arg0: i32) -> (i32, i32) {
    %c0_i32 = arith.constant 0 : i32
    %c0_i32_0 = arith.constant 0 : i32
    %c0_i32_1 = arith.constant 0 : i32
    return %c0_i32, %c0_i32_0 : i32, i32
  }
}

</mosaic_0001>

<bundles_post_ra>
// kernel: tpu_custom_call.1
= control target key start
LH: loop header
LB: loop body
LE: loop exit
PB: predicated region body
PF: predicated region fallthrough
CT: control target
= control target key end

     0   :  { %8 = vsyncpa [#allocation4], 0  ;;  %s1075_s12 = smov 0   ;;  %s1077_s13 = smov 0   ;;  %s1379_s0 = inlined_call_operand.vmem [shape: bf16[2,256,27], index: 0, kind: input, shape index: {}]   ;;  %s1380_s1 = inlined_call_operand.vmem [shape: bf16[27,128], index: 1, kind: input, shape index: {}]   ;;  %s1381_s2 = inlined_call_operand.vmem [shape: f32[1,128], index: 2, kind: input, shape index: {}]   ;;  %s1382_s3 = inlined_call_operand.hbm [shape: f32[2,128], index: 3, kind: output, shape index: {}]  }
   0x1   :  { %s1079_s14 = smov 0  }
   0x2 LB: > { %s1091_s15 = sadd.s32 4294967295, %s1050_s14   ;;  %s1094_s16 = sadd.s32 1, %s1050_s14   ;;  %s1050_s14 = sphi %s1079_s14, %s1385_s14   ;;  %s1046_s13 = sphi %s1077_s13, %s1384_s13   ;;  %s1042_s12 = sphi %s1075_s12, %s1383_s12  }
   0x3   : > { %s18_s17 = ssub.s32 %s1050_s14, %s1094_s16  ;;  %s21_s18 = sadd.s32 1, %s1046_s13 }
   0x4   : > { %p19_p0 = scmp.eq.s32.totalorder %s18_s17, 0  ;;  %p28_p1 = scmp.ne.s32.totalorder %s1046_s13, %s1042_s12 }
   0x5   : > { %p29_p2 = scmp.eq.s32.totalorder %s1050_s14, 0  ;;  %p836_p4 = scmp.ge.s32.totalorder %s1050_s14, 2 }
   0x6   : > { %s1103_s19 = scalar_select %p19_p0, %s1046_s13, %s21_s18  }
   0x7   : > { %p30_p3 = por %p29_p2, %p28_p1  ;;  %123 = sbr.rel (%p836_p4) target bundleno = 32 (0x20), region = 24 }
   0xc   : > { %126 = sbr.rel (!%p30_p3) target bundleno = 32 (0x20), region = 28  ;;  %s128_s20 = sand.u32 (%p30_p3), 1, %s1046_s13  }
   0xd   : > { %s937_s21 = sshll.u32 (%p30_p3), %s1050_s14, 6  ;;  %s837_s22 = sshll.u32 (%p30_p3), %s128_s20, 7 }
   0xe   : > { %s1111_s25 = scalar_lea.vmem (%p30_p3), %s1379_s0, %s937_s21  ;;  %s130_s26 = scalar_lea.vmem (%p30_p3), [#allocation2], %s837_s22 }
   0xf   : > { %v150_v0 = vld [vmem:[%s1111_s25] sm:$0xff] (%p30_p3)   ;;  %v154_v1 = vld [vmem:[%s1111_s25 + $0x8] sm:$0xff] (%p30_p3)   ;;  %v158_v2 = vld [vmem:[%s1111_s25 + $0x10] sm:$0xff] (%p30_p3)  }
  0x10   : > { %151 = vst [vmem:[%s130_s26] sm:$0xff] (%p30_p3), %v150_v0   ;;  %v162_v3 = vld [vmem:[%s1111_s25 + $0x18] sm:$0xff] (%p30_p3)   ;;  %v166_v4 = vld [vmem:[%s1111_s25 + $0x20] sm:$0xff] (%p30_p3)   ;;  %v170_v5 = vld [vmem:[%s1111_s25 + $0x28] sm:$0xff] (%p30_p3)  }
  0x11   : > { %155 = vst [vmem:[%s130_s26 + $0x8] sm:$0xff] %v154_v1   ;;  %v174_v6 = vld [vmem:[%s1111_s25 + $0x30] sm:$0xff]   ;;  %v178_v7 = vld [vmem:[%s1111_s25 + $0x38] sm:$0xff]   ;;  %v182_v8 = vld [vmem:[%s1111_s25 + $0x80] sm:$0xff]  }
  0x12   : > { %159 = vst [vmem:[%s130_s26 + $0x10] sm:$0xff] %v158_v2   ;;  %v186_v9 = vld [vmem:[%s1111_s25 + $0x88] sm:$0xff]   ;;  %v190_v10 = vld [vmem:[%s1111_s25 + $0x90] sm:$0xff]   ;;  %v194_v11 = vld [vmem:[%s1111_s25 + $0x98] sm:$0xff]  }
  0x13   : > { %163 = vst [vmem:[%s130_s26 + $0x18] sm:$0xff] %v162_v3   ;;  %v198_v12 = vld [vmem:[%s1111_s25 + $0xa0] sm:$0xff]   ;;  %v202_v13 = vld [vmem:[%s1111_s25 + $0xa8] sm:$0xff]   ;;  %v206_v14 = vld [vmem:[%s1111_s25 + $0xb0] sm:$0xff]  }
  0x14   : > { %167 = vst [vmem:[%s130_s26 + $0x20] sm:$0xff] %v166_v4   ;;  %v210_v15 = vld [vmem:[%s1111_s25 + $0xb8] sm:$0xff]  }
  0x15   : > { %171 = vst [vmem:[%s130_s26 + $0x28] sm:$0xff] %v170_v5  }
  0x16   : > { %175 = vst [vmem:[%s130_s26 + $0x30] sm:$0xff] %v174_v6  }
  0x17   : > { %179 = vst [vmem:[%s130_s26 + $0x38] sm:$0xff] %v178_v7  }
  0x18   : > { %183 = vst [vmem:[%s130_s26 + $0x40] sm:$0xff] %v182_v8  }
  0x19   : > { %187 = vst [vmem:[%s130_s26 + $0x48] sm:$0xff] %v186_v9  }
  0x1a   : > { %191 = vst [vmem:[%s130_s26 + $0x50] sm:$0xff] %v190_v10  }
  0x1b   : > { %195 = vst [vmem:[%s130_s26 + $0x58] sm:$0xff] %v194_v11  }
  0x1c   : > { %199 = vst [vmem:[%s130_s26 + $0x60] sm:$0xff] %v198_v12  }
  0x1d   : > { %203 = vst [vmem:[%s130_s26 + $0x68] sm:$0xff] %v202_v13  }
  0x1e   : > { %207 = vst [vmem:[%s130_s26 + $0x70] sm:$0xff] %v206_v14  }
  0x1f   : > { %211 = vst [vmem:[%s130_s26 + $0x78] sm:$0xff] %v210_v15  }
  0x20 PF: > { %p840_p5 = scmp.ge.s32.totalorder %s1050_s14, 1  ;;  %p300_p6 = scmp.lt.s32.totalorder %s1050_s14, 3 }
  0x22   : > { %p301_p7 = pnand %p840_p5, %p300_p6 }
  0x23   : > { %s307_s27 = sand.u32 (!%p301_p7), 1, %s1042_s12   ;;  %p842_p8 = scmp.ne.s32.totalorder (!%p301_p7), %s1091_s15, 0 }
  0x24   : > { %304 = sbr.rel (%p301_p7) target bundleno = 303 (0x12f), region = 69  ;;  %s841_s28 = sshll.u32 (!%p301_p7), %s307_s27, 7 }
  0x25   : > { %s1132_s29 = scalar_lea.vmem (!%p301_p7), [#allocation2], %s841_s28 }
  0x29   : > { %330 = sbr.rel (%p842_p8) target bundleno = 48 (0x30), region = 77 }
  0x2e   : > { %v1052_v16 = vmov 0.0  }
  0x2f   : > { %331 = vst [vmem:[#allocation3] sm:$0x3] %v1052_v16 }
  0x30 PF: > { %v913_v17 = vld [vmem:[%s1380_s1 + $0x8] sm:$0xf]  ;;  %v955_v18 = vld [vmem:[%s1380_s1 + $0x8] sm:$0x30]  ;;  %vm512_vm0 = vcmask 1044480   ;;  %vm513_vm1 = vcmask 1045504   ;;  %v641_v53 = vlaneseq }
  0x31   : > { %v914_v19 = vor.u32 %v955_v18, %v913_v17  ;;  %v1053_v20 = vmov 65535   ;;  %v954_v24 = vld [vmem:[%s1380_s1] sm:$0xff]  ;;  %vm463_vm2 = vcmask 220160   ;;  %v939_v29 = vld [vmem:[%s1132_s29 + $0x8] sm:$0xff]  ;;  %v940_v33 = vld [vmem:[%s1132_s29 + $0x10] sm:$0xff]  ;;  %s931_s9 = sshll.u32 %s1091_s15, 7 }
  0x32   : > { %v514_v21 = vsel %vm512_vm0, 4294967295, %v1053_v20  ;;  %v938_v25 = vld [vmem:[%s1132_s29] sm:$0xff]  ;;  %v947_v30 = vld [vmem:[%s1132_s29 + $0x48] sm:$0xff]  ;;  %v948_v34 = vld [vmem:[%s1132_s29 + $0x50] sm:$0xff]  ;;  %v1186_v56 = vshrl.u32 %v641_v53, 7  ;;  %v1199_v62 = vstv %s931_s9  ;;  %p932_p9 = scmp.ne.s32.totalorder %s1091_s15, 1 }
  0x33   : > { %v515_v22 = vsel %vm513_vm1, %v514_v21, 0  ;;  %v946_v26 = vld [vmem:[%s1132_s29 + $0x40] sm:$0xff]  ;;  %v951_v31 = vld [vmem:[%s1132_s29 + $0x68] sm:$0xff]  ;;  %v952_v35 = vld [vmem:[%s1132_s29 + $0x70] sm:$0xff] }
  0x34   : > { %v517_v23 = vand.u32 %v914_v19, %v515_v22  ;;  %v950_v27 = vld [vmem:[%s1132_s29 + $0x60] sm:$0xff]  ;;  %v943_v32 = vld [vmem:[%s1132_s29 + $0x28] sm:$0xff]  ;;  %v944_v36 = vld [vmem:[%s1132_s29 + $0x30] sm:$0xff]  ;;  %v643_v58 = vadd.s32 8, %v1186_v56  ;;  %v650_v63 = vadd.s32 64, %v1186_v56  ;;  %v644_v0 = vadd.s32 16, %v1186_v56 }
  0x35   : > { %v942_v28 = vld [vmem:[%s1132_s29 + $0x20] sm:$0xff]  ;;  %v941_v37 = vld [vmem:[%s1132_s29 + $0x18] sm:$0xff]  ;;  %v645_v1 = vadd.s32 24, %v1186_v56  ;;  %v659_v2 = vadd.s32 %v1199_v62, %v1186_v56  ;;  %v646_v7 = vadd.s32 32, %v1186_v56  ;;  %v651_v12 = vadd.s32 72, %v1186_v56 }
  0x36   : > { %525 = vmatpush.bf16.msra.mxu0 %v517_v23  ;;  %957 = vmatpush.bf16.msra.mxu2 %v517_v23  ;;  %v949_v38 = vld [vmem:[%s1132_s29 + $0x58] sm:$0xff]  ;;  %v1197_v61 = vld [vmem:[%s1381_s2] ss:$0 sm:$0xff]  ;;  %v1207_v3 = vadd.s32 %v1199_v62, %v643_v58  ;;  %v667_v6 = vadd.s32 %v1199_v62, %v650_v63  ;;  %v1216_v9 = vadd.s32 %v1199_v62, %v644_v0  ;;  %v652_v15 = vadd.s32 80, %v1186_v56 }
  0x37   : > { %958 = vmatpush.bf16.msra.mxu3 %v517_v23  ;;  %956 = vmatpush.bf16.msra.mxu1 %v517_v23  ;;  %v953_v39 = vld [vmem:[%s1132_s29 + $0x78] sm:$0xff]  ;;  %v1221_v13 = vadd.s32 %v1199_v62, %v645_v1  ;;  %vm675_vm3 = vcmp.lt.s32.totalorder %v659_v2, 225  ;;  %v1228_v19 = vadd.s32 %v1199_v62, %v646_v7  ;;  %v653_v22 = vadd.s32 88, %v1186_v56 }
  0x38   : > { %v945_v40 = vld [vmem:[%s1132_s29 + $0x38] sm:$0xff]  ;;  %vm676_vm4 = vcmp.lt.s32.totalorder %v1207_v3, 225  ;;  %vm683_vm5 = vcmp.lt.s32.totalorder %v667_v6, 225  ;;  %vm677_vm6 = vcmp.lt.s32.totalorder %v1216_v9, 225  ;;  %v649_v1 = vadd.s32 56, %v1186_v56 }
  0x39   : > { %vm678_vm7 = vcmp.lt.s32.totalorder %v1221_v13, 225  ;;  %vm679_vm8 = vcmp.lt.s32.totalorder %v1228_v19, 225 }
  0x3a   : > { %526 = vmatpush.bf16.msra.mxu0 %v954_v24  ;;  %960 = vmatpush.bf16.msra.mxu2 %v954_v24 }
  0x3b   : > { %961 = vmatpush.bf16.msra.mxu3 %v954_v24  ;;  %959 = vmatpush.bf16.msra.mxu1 %v954_v24 }
  0x3d   : > { %915 = vmatmul.msk.bf16.vlgmr.msra.gmra.mxu0 %vm463_vm2, %v938_v25  ;;  %923 = vmatmul.msk.bf16.vlgmr.msra.gmra.mxu2 %vm463_vm2, %v946_v26  ;;  %v1236_v25 = vadd.s32 %v1199_v62, %v651_v12 }
  0x3e   : > { %927 = vmatmul.msk.bf16.vlgmr.msra.gmra.mxu3 %vm463_vm2, %v950_v27  ;;  %919 = vmatmul.msk.bf16.vlgmr.msra.gmra.mxu1 %vm463_vm2, %v942_v28 }
  0x3f   : > { %vm684_vm9 = vcmp.lt.s32.totalorder %v1236_v25, 225 }
  0x4d   : > { %916 = vmatmul.msk.bf16.gmra.mxu0 %vm463_vm2, %v939_v29  ;;  %924 = vmatmul.msk.bf16.gmra.mxu2 %vm463_vm2, %v947_v30  ;;  %v1242_v29 = vadd.s32 %v1199_v62, %v652_v15  ;;  %v647_v30 = vadd.s32 40, %v1186_v56 }
  0x4e   : > { %928 = vmatmul.msk.bf16.gmra.mxu3 %vm463_vm2, %v951_v31  ;;  %920 = vmatmul.msk.bf16.gmra.mxu1 %vm463_vm2, %v943_v32 }
  0x4f   : > { %vm685_vm11 = vcmp.lt.s32.totalorder %v1242_v29, 225 }
  0x5d   : > { %917 = vmatmul.msk.bf16.gmra.mxu0 %vm463_vm2, %v940_v33  ;;  %925 = vmatmul.msk.bf16.gmra.mxu2 %vm463_vm2, %v948_v34 }
  0x5e   : > { %929 = vmatmul.msk.bf16.gmra.mxu3 %vm463_vm2, %v952_v35  ;;  %921 = vmatmul.msk.bf16.gmra.mxu1 %vm463_vm2, %v944_v36  ;;  %v1252_v36 = vadd.s32 %v1199_v62, %v653_v22 }
  0x60   : > { %vm686_vm13 = vcmp.lt.s32.totalorder %v1252_v36, 225 }
  0x6d   : > { %918 = vmatmul.msk.bf16.gmra.mxu0 %vm463_vm2, %v941_v37  ;;  %926 = vmatmul.msk.bf16.gmra.mxu2 %vm463_vm2, %v949_v38  ;;  %v648_v38 = vadd.s32 48, %v1186_v56 }
  0x6e   : > { %930 = vmatmul.msk.bf16.gmra.mxu3 %vm463_vm2, %v953_v39  ;;  %922 = vmatmul.msk.bf16.gmra.mxu1 %vm463_vm2, %v945_v40 }
  0xba   : > { %v528_v41 = vpop.f32.mrf.mxu0 }
  0xbb   : > { %v548_v42 = vpop.f32.mrf.mxu1  ;;  %v529_v5 = vadd.f32 %v1197_v61, %v528_v41 }
  0xbc   : > { %v549_v8 = vadd.f32 %v1197_v61, %v548_v42 }
  0xbd   : > { %v608_v17 = vmax.f32 %v529_v5, 0.0 }
  0xbe   : > { %v616_v20 = vmax.f32 %v549_v8, 0.0 }
  0xbf   : > { %v691_v31 = vsel %vm675_vm3, %v608_v17, 0.0 }
  0xc0   : > { %v568_v43 = vpop.f32.mrf.mxu2  ;;  %v1249_v34 = vsel %vm683_vm5, %v616_v20, 0.0  ;;  %v666_v20 = vadd.s32 %v1199_v62, %v649_v1  ;;  %v656_v1 = vadd.s32 112, %v1186_v56 }
  0xc1   : > { %v588_v44 = vpop.f32.mrf.mxu3  ;;  %v569_v14 = vadd.f32 %v1197_v61, %v568_v43 }
  0xc2   : > { %v530_v45 = vpop.f32.mrf.mxu0  ;;  %v589_v21 = vadd.f32 %v1197_v61, %v588_v44  ;;  %vm682_vm14 = vcmp.lt.s32.totalorder %v666_v20, 225 }
  0xc3   : > { %v1176_v46 = vpop.f32.mrf.mxu1  ;;  %v531_v11 = vadd.f32 %v1197_v61, %v530_v45  ;;  %v624_v27 = vmax.f32 %v569_v14, 0.0 }
  0xc4   : > { %v632_v35 = vmax.f32 %v589_v21, 0.0 }
  0xc5   : > { %v609_v24 = vmax.f32 %v531_v11, 0.0  ;;  %v707_v44 = vsel %vm675_vm3, %v624_v27, 0.0  ;;  %vm768_vm3 = vcmask 1041409  }
  0xc6   : > { %v1272_v0 = vsel %vm683_vm5, %v632_v35, 0.0 }
  0xc7   : > { %v692_v40 = vsel %vm676_vm4, %v609_v24, 0.0 }
  0xc8   : > { %v570_v47 = vpop.f32.mrf.mxu2  ;;  %v724_v63 = vadd.f32 %v692_v40, %v691_v31 }
  0xc9   : > { %v1178_v48 = vpop.f32.mrf.mxu3  ;;  %v571_v28 = vadd.f32 %v1197_v61, %v570_v47  ;;  %v551_v47 = vadd.f32 %v1197_v61, %v1176_v46  ;;  %v665_v46 = vadd.s32 %v1199_v62, %v648_v38 }
  0xca   : > { %v533_v49 = vpop.f32.mrf.mxu0 }
  0xcb   : > { %v1180_v50 = vpop.f32.mrf.mxu1  ;;  %v534_v18 = vadd.f32 %v1197_v61, %v533_v49  ;;  %v625_v45 = vmax.f32 %v571_v28, 0.0  ;;  %v664_v49 = vadd.s32 %v1199_v62, %v647_v30  ;;  %v617_v12 = vmax.f32 %v551_v47, 0.0 }
  0xcc   : > { %vm681_vm12 = vcmp.lt.s32.totalorder %v665_v46, 225  ;;  %v1295_v28 = vadd.f32 %v1197_v61, %v1178_v48  ;;  %v554_v30 = vadd.f32 %v1197_v61, %v1180_v50 }
  0xcd   : > { %v610_v32 = vmax.f32 %v534_v18, 0.0  ;;  %vm680_vm10 = vcmp.lt.s32.totalorder %v664_v49, 225  ;;  %v700_v50 = vsel %vm684_vm9, %v617_v12, 0.0 }
  0xd0   : > { %v573_v51 = vpop.f32.mrf.mxu2 }
  0xd1   : > { %v1182_v52 = vpop.f32.mrf.mxu3  ;;  %v574_v41 = vadd.f32 %v1197_v61, %v573_v51 }
  0xd2   : > { %v535_v54 = vpop.f32.mrf.mxu0 }
  0xd3   : > { %v1184_v55 = vpop.f32.mrf.mxu1  ;;  %v536_v26 = vadd.f32 %v1197_v61, %v535_v54  ;;  %v693_v54 = vsel %vm677_vm6, %v610_v32, 0.0  ;;  %v626_v2 = vmax.f32 %v574_v41, 0.0 }
  0xd4   : > { %v725_v11 = vadd.f32 %v724_v63, %v693_v54  ;;  %v633_v54 = vmax.f32 %v1295_v28, 0.0 }
  0xd5   : > { %v611_v42 = vmax.f32 %v536_v26, 0.0  ;;  %v709_v21 = vsel %vm677_vm6, %v626_v2, 0.0 }
  0xd7   : > { %v694_v5 = vsel %vm678_vm7, %v611_v42, 0.0 }
  0xd8   : > { %v1189_v57 = vpop.f32.mrf.mxu2  ;;  %v726_v18 = vadd.f32 %v725_v11, %v694_v5 }
  0xd9   : > { %v1192_v60 = vpop.f32.mrf.mxu3  ;;  %v576_v51 = vadd.f32 %v1197_v61, %v1189_v57  ;;  %v708_v57 = vsel %vm676_vm4, %v625_v45, 0.0 }
  0xda   : > { %v538_v59 = vpop.f32.mrf.mxu0  ;;  %v745_v27 = vadd.f32 %v708_v57, %v707_v44  ;;  %v618_v44 = vmax.f32 %v554_v30, 0.0 }
  0xdb   : > { %v1209_v4 = vpop.f32.mrf.mxu1  ;;  %v539_v33 = vadd.f32 %v1197_v61, %v538_v59  ;;  %v627_v14 = vmax.f32 %v576_v51, 0.0  ;;  %v556_v51 = vadd.f32 %v1197_v61, %v1184_v55 }
  0xdc   : > { %v746_v40 = vadd.f32 %v745_v27, %v709_v21  ;;  %v701_v57 = vsel %vm685_vm11, %v618_v44, 0.0 }
  0xdd   : > { %v612_v58 = vmax.f32 %v539_v33, 0.0  ;;  %v710_v9 = vsel %vm678_vm7, %v627_v14, 0.0 }
  0xde   : > { %v747_v45 = vadd.f32 %v746_v40, %v710_v9 }
  0xdf   : > { %v695_v15 = vsel %vm679_vm8, %v612_v58, 0.0 }
  0xe0   : > { %v578_v10 = vpop.f32.mrf.mxu2  ;;  %v727_v31 = vadd.f32 %v726_v18, %v695_v15  ;;  %v619_v15 = vmax.f32 %v556_v51, 0.0  ;;  %v673_v18 = vadd.s32 %v1199_v62, %v656_v1 }
  0xe1   : > { %v1233_v23 = vpop.f32.mrf.mxu3  ;;  %v579_v7 = vadd.f32 %v1197_v61, %v578_v10  ;;  %v654_v10 = vadd.s32 96, %v1186_v56 }
  0xe2   : > { %v540_v16 = vpop.f32.mrf.mxu0  ;;  %v702_v28 = vsel %vm686_vm13, %v619_v15, 0.0  ;;  %vm689_vm1 = vcmp.lt.s32.totalorder %v673_v18, 225 }
  0xe3   : > { %v1255_v39 = vpop.f32.mrf.mxu1  ;;  %v541_v43 = vadd.f32 %v1197_v61, %v540_v16  ;;  %v628_v22 = vmax.f32 %v579_v7, 0.0  ;;  %v1305_v48 = vadd.s32 %v1199_v62, %v654_v10  ;;  %v594_v7 = vadd.f32 %v1197_v61, %v1182_v52 }
  0xe5   : > { %v613_v8 = vmax.f32 %v541_v43, 0.0  ;;  %v711_v13 = vsel %vm679_vm8, %v628_v22, 0.0  ;;  %vm687_vm15 = vcmp.lt.s32.totalorder %v1305_v48, 225  ;;  %v634_v21 = vmax.f32 %v594_v7, 0.0 }
  0xe6   : > { %v748_v63 = vadd.f32 %v747_v45, %v711_v13  ;;  %v596_v22 = vadd.f32 %v1197_v61, %v1192_v60 }
  0xe7   : > { %v696_v24 = vsel %vm680_vm10, %v613_v8, 0.0  ;;  %v559_v8 = vadd.f32 %v1197_v61, %v1209_v4 }
  0xe8   : > { %v580_v37 = vpop.f32.mrf.mxu2  ;;  %v728_v41 = vadd.f32 %v727_v31, %v696_v24 }
  0xe9   : > { %v1281_v6 = vpop.f32.mrf.mxu3  ;;  %v581_v16 = vadd.f32 %v1197_v61, %v580_v37  ;;  %v620_v24 = vmax.f32 %v559_v8, 0.0 }
  0xea   : > { %v543_v53 = vpop.f32.mrf.mxu0 }
  0xeb   : > { %v544_v59 = vadd.f32 %v1197_v61, %v543_v53  ;;  %v563_v33 = vpop.f32.mrf.mxu1  ;;  %v629_v35 = vmax.f32 %v581_v16, 0.0  ;;  %v655_v53 = vadd.s32 104, %v1186_v56  ;;  %v561_v16 = vadd.f32 %v1197_v61, %v1255_v39 }
  0xec   : > { %v564_v52 = vadd.f32 %v1197_v61, %v563_v33  ;;  %v599_v39 = vadd.f32 %v1197_v61, %v1233_v23  ;;  %v716_v33 = vsel %vm684_vm9, %v633_v54, 0.0  ;;  %v635_v23 = vmax.f32 %v596_v22, 0.0 }
  0xed   : > { %v614_v17 = vmax.f32 %v544_v59, 0.0  ;;  %v712_v58 = vsel %vm680_vm10, %v629_v35, 0.0  ;;  %v672_v12 = vadd.s32 %v1199_v62, %v655_v53  ;;  %v621_v30 = vmax.f32 %v561_v16, 0.0 }
  0xee   : > { %v749_v11 = vadd.f32 %v748_v63, %v712_v58  ;;  %v622_v31 = vmax.f32 %v564_v52, 0.0  ;;  %v703_v9 = vsel %vm687_vm15, %v620_v24, 0.0  ;;  %v601_v35 = vadd.f32 %v1197_v61, %v1281_v6  ;;  %v723_v52 = vld [vmem:[#allocation3] sm:$0x3] }
  0xef   : > { %v697_v37 = vsel %vm681_vm12, %v614_v17, 0.0  ;;  %vm688_vm0 = vcmp.lt.s32.totalorder %v672_v12, 225  ;;  %v718_v6 = vsel %vm686_vm13, %v635_v23, 0.0 }
  0xf0   : > { %v583_v3 = vpop.f32.mrf.mxu2  ;;  %v729_v47 = vadd.f32 %v728_v41, %v697_v37  ;;  %v717_v37 = vsel %vm685_vm11, %v634_v21, 0.0  ;;  %v637_v44 = vmax.f32 %v601_v35, 0.0 }
  0xf1   : > { %v584_v26 = vadd.f32 %v1197_v61, %v583_v3  ;;  %v603_v5 = vpop.f32.mrf.mxu3  ;;  %v657_v3 = vadd.s32 120, %v1186_v56 }
  0xf2   : > { %v545_v32 = vpop.f32.mrf.mxu0  ;;  %v604_v25 = vadd.f32 %v1197_v61, %v603_v5  ;;  %v720_v63 = vsel %vm688_vm0, %v637_v44, 0.0 }
  0xf3   : > { %v546_v38 = vadd.f32 %v1197_v61, %v545_v32  ;;  %v630_v42 = vmax.f32 %v584_v26, 0.0  ;;  %v565_v10 = vpop.f32.mrf.mxu1  ;;  %v674_v20 = vadd.s32 %v1199_v62, %v657_v3  ;;  %v705_v62 = vsel %vm689_vm1, %v622_v31, 0.0 }
  0xf4   : > { %v566_v56 = vadd.f32 %v1197_v61, %v565_v10  ;;  %v638_v54 = vmax.f32 %v604_v25, 0.0 }
  0xf5   : > { %v615_v43 = vmax.f32 %v546_v38, 0.0  ;;  %v713_v55 = vsel %vm681_vm12, %v630_v42, 0.0  ;;  %v636_v38 = vmax.f32 %v599_v39, 0.0  ;;  %vm690_vm2 = vcmp.lt.s32.totalorder %v674_v20, 225 }
  0xf6   : > { %v750_v4 = vadd.f32 %v749_v11, %v713_v55  ;;  %v623_v13 = vmax.f32 %v566_v56, 0.0  ;;  %v721_v36 = vsel %vm689_vm1, %v638_v54, 0.0 }
  0xf7   : > { %v698_v59 = vsel %vm682_vm14, %v615_v43, 0.0  ;;  %v719_v53 = vsel %vm687_vm15, %v636_v38, 0.0 }
  0xf8   : > { %v730_v19 = vadd.f32 %v729_v47, %v698_v59  ;;  %v585_v2 = vpop.f32.mrf.mxu2  ;;  %v706_v51 = vsel %vm690_vm2, %v623_v13, 0.0 }
  0xf9   : > { %v586_v49 = vadd.f32 %v1197_v61, %v585_v2 }
  0xfa   : > { %v731_v14 = vadd.f32 %v730_v19, %v1249_v34 }
  0xfb   : > { %v631_v17 = vmax.f32 %v586_v49, 0.0 }
  0xfc   : > { %v732_v46 = vadd.f32 %v731_v14, %v700_v50  ;;  %v605_v50 = vpop.f32.mrf.mxu3 }
  0xfd   : > { %v714_v34 = vsel %vm682_vm14, %v631_v17, 0.0  ;;  %v606_v29 = vadd.f32 %v1197_v61, %v605_v50 }
  0xfe   : > { %v733_v26 = vadd.f32 %v732_v46, %v701_v57  ;;  %v751_v27 = vadd.f32 %v750_v4, %v714_v34 }
  0xff   : > { %v639_v19 = vmax.f32 %v606_v29, 0.0 }
 0x100   : > { %v734_v32 = vadd.f32 %v733_v26, %v702_v28  ;;  %v752_v60 = vadd.f32 %v751_v27, %v1272_v0  ;;  %v704_v0 = vsel %vm688_vm0, %v621_v30, 0.0 }
 0x101   : > { %v722_v61 = vsel %vm690_vm2, %v639_v19, 0.0 }
 0x102   : > { %v735_v40 = vadd.f32 %v734_v32, %v703_v9  ;;  %v753_v41 = vadd.f32 %v752_v60, %v716_v33 }
 0x104   : > { %v736_v42 = vadd.f32 %v735_v40, %v704_v0  ;;  %v754_v43 = vadd.f32 %v753_v41, %v717_v37 }
 0x106   : > { %v737_v45 = vadd.f32 %v736_v42, %v705_v62  ;;  %v755_v47 = vadd.f32 %v754_v43, %v718_v6 }
 0x108   : > { %v756_v58 = vadd.f32 %v755_v47, %v719_v53  ;;  %v738_v59 = vadd.f32 %v737_v45, %v706_v51 }
 0x10a   : > { %v757_v1 = vadd.f32 %v756_v58, %v720_v63  ;;  %v739_v2 = vrot.slane %v738_v59, 4 }
 0x10c   : > { %v758_v5 = vadd.f32 %v757_v1, %v721_v36  ;;  %v740_v7 = vadd.f32 %v739_v2, %v738_v59 }
 0x10e   : > { %v741_v8 = vrot.slane %v740_v7, 2  ;;  %v759_v55 = vadd.f32 %v758_v5, %v722_v61 }
 0x110   : > { %v760_v48 = vrot.slane %v759_v55, 4  ;;  %v742_v49 = vadd.f32 %v741_v8, %v740_v7 }
 0x112   : > { %v761_v57 = vadd.f32 %v760_v48, %v759_v55  ;;  %v743_v14 = vrot.slane %v742_v49, 1 }
 0x114   : > { %v762_v11 = vrot.slane %v761_v57, 2  ;;  %v744_v12 = vadd.f32 %v743_v14, %v742_v49 }
 0x116   : > { %v763_v15 = vadd.f32 %v762_v11, %v761_v57 }
 0x118   : > { %v764_v16 = vrot.slane %v763_v15, 1 }
 0x11a   : > { %v765_v17 = vadd.f32 %v764_v16, %v763_v15 }
 0x11b   : > { %776 = sbr.rel (%p932_p9) target bundleno = 298 (0x12a), region = 81 }
 0x11c   : > { %v769_v4 = vsel %vm768_vm3, %v765_v17, %v744_v12 }
 0x11d   : > { %v771_v46 = vadd.f32 %v769_v4, %v723_v52 }
 0x11f   : > { %772 = vst [vmem:[#allocation3] sm:$0x3] %v771_v46 }
 0x126   : > { %v777_v18 = vld [vmem:[#allocation3] sm:$0x3] }
 0x127   : > { %v778_v10 = vmul.f32 0.0044444446, %v777_v18 }
 0x129   : > { %779 = vst [vmem:[#allocation3] sm:$0x3] %v778_v10 }
 0x12a PF: > { %p966_p10 = scmp.eq.s32.totalorder %s1091_s15, 1  ;;  %s1054_s12 = smov [#allocation3]  }
 0x12b   : > { %s786_s14 = sshll.u32 %s1054_s12, 4  ;;  %s788_s20 = sshll.u32 %s1382_s3, 4  ;;  %s787_s14 = int_to_ptr.vmem [resolvable:$true] %s786_s14  ;;  %s789_s20 = int_to_ptr.hbm [resolvable:$true] %s788_s20 }
 0x12c   : > { %963 = dma.vmem_to_hbm [thread:$0]  (%p966_p10), %s787_s14, 32, %s789_s20, [#allocation4]  }
 0x12d   : > { %1037 = dma.done.wait (%p966_p10), [#allocation4], 32  }
 0x12e   : > { %1039 = vsyncadd (%p966_p10), [#allocation4], 4294967264 }
 0x12f PF: > { %p11_p11 = scmp.ge.s32.totalorder %s1094_s16, 4   ;;  %s1383_s12 = smov %s1046_s13 }
 0x130   : > { %s1384_s13 = smov %s1103_s19  ;;  %s1385_s14 = smov %s1094_s16 }
 0x131   :  { %13 = sbr.rel (!%p11_p11) target bundleno = 2 (0x2), region = 113 }
 0x136   :  { %802 = vsyncpa [#allocation4], 1 }
 0x137   :  { %804 = vsyncpa [#allocation4 + $0x1], 1 }

</bundles_post_ra>
